<compile_context>
chip_gen: v5e
topology: v5e:2x2
jax: 0.10.0
libtpu: 0.0.40
codegen_flags: <defaults>
</compile_context>

<pallas_src>
import functools
import numpy as np
import jax
import jax.numpy as jnp
from jax.experimental import pallas as pl
from jax.experimental.pallas import tpu as pltpu


# ----------------------------- host-side helpers -----------------------------

def _interp_matrix(out_size, in_size, align_corners=False):
    """Row-stochastic matrix A (out_size, in_size): up = A @ small (PyTorch bilinear)."""
    A = np.zeros((out_size, in_size), np.float32)
    for d in range(out_size):
        if align_corners:
            src = 0.0 if out_size == 1 else d * (in_size - 1) / (out_size - 1)
        else:
            src = (d + 0.5) * in_size / out_size - 0.5
            if src < 0.0:
                src = 0.0
        i0 = min(int(np.floor(src)), in_size - 1)
        i1 = i0 + 1 if i0 < in_size - 1 else i0
        l1 = src - i0
        A[d, i0] += 1.0 - l1
        A[d, i1] += l1
    return A


def _adaptive_pool_matrix(out_size, in_size):
    """P (out_size, in_size): pooled = P @ x  (PyTorch AdaptiveAvgPool regions)."""
    P = np.zeros((out_size, in_size), np.float32)
    for i in range(out_size):
        start = (i * in_size) // out_size
        end = int(np.ceil((i + 1) * in_size / out_size))
        P[i, start:end] = 1.0 / (end - start)
    return P


def _shifted_upsample_cols(M, H, W):
    """Fold (bilinear upsample ∘ 3x3 shift ∘ zero pad) into one (9*s*s, H*W) matrix.

    M: (H*W, s*s) upsample matrix.  Row j*s*s+p, column y*W+x holds
    M[(y+oy)*W + (x+ox), p] for tap j (offsets oy,ox in {-1,0,1}) when in-bounds, else 0.
    Vectorized (no per-pixel Python loop).
    """
    s2 = M.shape[1]
    Mg = M.reshape(H, W, s2)
    cols = np.zeros((9, s2, H, W), np.float32)
    for j in range(9):
        oy, ox = j // 3 - 1, j % 3 - 1
        ydst = slice(max(0, -oy), H - max(0, oy))
        xdst = slice(max(0, -ox), W - max(0, ox))
        ysrc = slice(max(0, oy), H - max(0, -oy))
        xsrc = slice(max(0, ox), W - max(0, -ox))
        cols[j, :, ydst, xdst] = np.transpose(Mg[ysrc, xsrc, :], (2, 0, 1))
    return cols.reshape(9 * s2, H * W)


@functools.lru_cache(maxsize=None)
def _stage_geometry(H, W, s, align_corners):
    """Cached per-stage geometry: pool matrix (s*s, H*W) (None for s==1) and the
    folded (upsample ∘ shift ∘ pad) matrix (9*s*s, H*W)."""
    M = np.kron(_interp_matrix(H, s, align_corners),
                _interp_matrix(W, s, align_corners))                     # (H*W, s*s)
    colm = _shifted_upsample_cols(M, H, W)                               # (9*s*s, H*W)
    P = None
    if s > 1:
        P = np.kron(_adaptive_pool_matrix(s, H), _adaptive_pool_matrix(s, W))  # (s*s, H*W)
    return P, colm


def _fold_bn(gamma, beta, mean, var, eps=1e-5):
    scale = gamma / jnp.sqrt(var + eps)
    bias = beta - mean * scale
    return scale, bias


# --------------------------------- kernel ------------------------------------

def _make_kernel(bin_sizes, nb, c_in, c_inter, c_out):
    f32 = jnp.float32
    bf16 = jnp.bfloat16

    def kernel(*refs):
        it = iter(refs)
        x = next(it)[...]                                   # (nb*c_in, HW) bf16

        stage_refs = []
        for s in bin_sizes:
            if s > 1:
                p_ref = next(it)
                srep_ref = next(it)
            else:
                p_ref = None
                srep_ref = None
            w1t_ref = next(it)
            b1_ref = next(it)
            mask_ref = next(it)
            colm_ref = next(it)
            stage_refs.append((s, p_ref, srep_ref, w1t_ref, b1_ref, mask_ref, colm_ref))

        w3all = next(it)[...]                               # (c_out, 9*c_inter) bf16
        b3_ref = next(it)
        out_ref = next(it)

        y = None
        for (s, p_ref, srep_ref, w1t_ref, b1_ref, mask_ref, colm_ref) in stage_refs:
            s2 = s * s
            # ---- adaptive average pool (batch stacked along sublanes / M axis) ----
            if s == 1:
                pooled = jnp.mean(x.astype(f32), axis=1, keepdims=True)   # (nb*c_in, 1)
            else:
                # lane-dense K on both operands: contract the H*W axis of x and P
                pooled = jax.lax.dot_general(
                    x, p_ref[...], (((1,), (1,)), ((), ())),
                    preferred_element_type=f32)                           # (nb*c_in, s*s)
            pooled16 = pooled.astype(bf16)

            w1t = w1t_ref[...]                               # (c_inter, c_in) bf16
            b1 = b1_ref[...]                                 # (c_inter, 1)    f32
            mask = mask_ref[...]                             # (9*c_inter, 9*s2) f32 0/1

            t_parts = []
            for b in range(nb):                              # short unrolled batch loop
                pooled_b = pooled16[b * c_in:(b + 1) * c_in, :]
                # folded 1x1 ConvBNReLU
                a = jnp.maximum(
                    jnp.dot(w1t, pooled_b, preferred_element_type=f32) + b1, 0.0)
                # block-diagonal replication of `a` -> all 9 hoisted 3x3 taps in ONE matmul
                atall = jnp.concatenate([a] * 9, axis=0)     # (9*c_inter, s2)
                if s == 1:
                    rhs = atall * mask                       # lane broadcast (s2 == 1)
                else:
                    rhs = jnp.dot(atall, srep_ref[...],
                                  preferred_element_type=f32) * mask      # (9*c_inter, 9*s2)
                t_parts.append(
                    jnp.dot(w3all, rhs.astype(bf16),
                            preferred_element_type=f32))     # (c_out, 9*s2)
            t = jnp.concatenate(t_parts, axis=0).astype(bf16)  # (nb*c_out, 9*s2)

            # ---- fused (upsample ∘ shift ∘ pad) + 3x3-conv: ONE HW-wide matmul ----
            y_k = jnp.dot(t, colm_ref[...], preferred_element_type=f32)   # (nb*c_out, HW)
            y = y_k if y is None else y + y_k

        out_ref[...] = jnp.maximum(y + b3_ref[...], 0.0)     # lane-dense f32 store

    return kernel


# --------------------------------- wrapper -----------------------------------

def _pick_batch_blocks(N, c_in, c_out):
    """Single grid step on single-TC v5e/v6e; 2-wide parallel grid on v7x
    (2 TensorCores/chip) when the per-block sublane counts stay 8-aligned."""
    try:
        kind = jax.devices()[0].device_kind.lower()
    except Exception:
        kind = ""
    if "v7" in kind and N % 2 == 0:
        nb = N // 2
        if (nb * c_in) % 8 == 0 and (nb * c_out) % 8 == 0:
            return 2
    return 1


def pp_context_module(x_nchw, params, bin_sizes=(1, 3), align_corners=False,
                      num_batch_blocks=None):
    N, c_in, H, W = x_nchw.shape
    HW = H * W
    c_inter = params["w1"][0].shape[1]
    c_out = params["w3"].shape[-1]

    G = num_batch_blocks if num_batch_blocks is not None else _pick_batch_blocks(N, c_in, c_out)
    assert N % G == 0
    nb = N // G

    # NCHW -> flat (N*C_in, H*W); channels-first kept end-to-end, lane axis = H*W.
    # HW here is a multiple of 128 so every HW-wide operand / output store stays
    # unmasked full-lane (pad spatially on the host otherwise).
    x2d = jnp.asarray(x_nchw).reshape(N * c_in, HW).astype(jnp.bfloat16)

    inputs = [x2d]
    in_specs = [pl.BlockSpec((nb * c_in, HW), lambda g: (g, 0))]

    for k, s in enumerate(bin_sizes):
        s = int(s)
        s2 = s * s
        P, colm = _stage_geometry(H, W, s, bool(align_corners))

        # fold BN scale of the 1x1 ConvBNReLU into the weight: w1t[d, c] = w1[c, d]*s1[d]
        w1 = np.asarray(params["w1"][k], np.float32)                       # (c_in, c_inter)
        s1 = np.asarray(params["s1"][k], np.float32).reshape(-1)
        b1 = np.asarray(params["b1"][k], np.float32).reshape(c_inter, 1)
        w1t = np.ascontiguousarray((w1 * s1[None, :]).T)                   # (c_inter, c_in)

        # constants for the block-diagonal tap replication (all 0/1)
        mask = np.kron(np.eye(9, dtype=np.float32),
                       np.ones((c_inter, s2), np.float32))                 # (9*c_inter, 9*s2)

        if s > 1:
            srep = np.tile(np.eye(s2, dtype=np.float32), (1, 9))           # (s2, 9*s2)
            inputs.append(jnp.asarray(P, jnp.bfloat16))                    # (s2, HW) lane-dense
            in_specs.append(pl.BlockSpec((s2, HW), lambda g: (0, 0)))
            inputs.append(jnp.asarray(srep, jnp.float32))
            in_specs.append(pl.BlockSpec((s2, 9 * s2), lambda g: (0, 0)))

        inputs += [jnp.asarray(w1t, jnp.bfloat16),
                   jnp.asarray(b1, jnp.float32),
                   jnp.asarray(mask, jnp.float32),
                   jnp.asarray(colm, jnp.bfloat16)]
        in_specs += [
            pl.BlockSpec((c_inter, c_in), lambda g: (0, 0)),
            pl.BlockSpec((c_inter, 1), lambda g: (0, 0)),
            pl.BlockSpec((9 * c_inter, 9 * s2), lambda g: (0, 0)),
            pl.BlockSpec((9 * s2, HW), lambda g: (0, 0)),
        ]

    # fold BN scale of the 3x3 ConvBNReLU into the weight, laid out for the hoisted-taps
    # matmul: w3all[o, j*c_inter + c] = w3[j, c, o] * s3[o]
    w3 = np.asarray(params["w3"], np.float32)                              # (9, c_inter, c_out)
    s3 = np.asarray(params["s3"], np.float32).reshape(-1)
    b3 = np.asarray(params["b3"], np.float32).reshape(c_out, 1)
    w3all = np.ascontiguousarray(
        np.transpose(w3 * s3[None, None, :], (2, 0, 1)).reshape(c_out, 9 * c_inter))
    b3t = np.tile(b3, (nb, 1))                                             # (nb*c_out, 1)

    inputs += [jnp.asarray(w3all, jnp.bfloat16), jnp.asarray(b3t, jnp.float32)]
    in_specs += [
        pl.BlockSpec((c_out, 9 * c_inter), lambda g: (0, 0)),
        pl.BlockSpec((nb * c_out, 1), lambda g: (0, 0)),
    ]

    kernel = _make_kernel(tuple(int(s) for s in bin_sizes), nb, c_in, c_inter, c_out)
    out = pl.pallas_call(
        kernel,
        out_shape=jax.ShapeDtypeStruct((N * c_out, HW), jnp.float32),
        grid_spec=pltpu.PrefetchScalarGridSpec(
            num_scalar_prefetch=0,
            grid=(G,),
            in_specs=in_specs,
            # constant-index operands are never re-fetched across grid steps; at
            # production sizes on v7x consider pipeline_mode=pl.Buffered(1) on them.
            out_specs=pl.BlockSpec((nb * c_out, HW), lambda g: (g, 0)),
        ),
        compiler_params=pltpu.CompilerParams(dimension_semantics=("parallel",)),
    )(*inputs)
    return out.reshape(N, c_out, H, W)          # pure metadata reshape back to NCHW


# ------------------------- deterministic parameter init ----------------------

def init_params(key, c_in, c_inter, c_out, n_stages):
    keys = iter(jax.random.split(key, 5 * n_stages + 5))
    params = {"w1": [], "s1": [], "b1": []}
    for _ in range(n_stages):
        w = jax.random.normal(next(keys), (c_in, c_inter), jnp.float32) * 0.1
        gamma = jax.random.uniform(next(keys), (c_inter,), minval=0.5, maxval=1.5)
        beta = jax.random.normal(next(keys), (c_inter,)) * 0.1
        mean = jax.random.normal(next(keys), (c_inter,)) * 0.1
        var = jax.random.uniform(next(keys), (c_inter,), minval=0.5, maxval=1.5)
        scale, bias = _fold_bn(gamma, beta, mean, var)
        params["w1"].append(w)
        params["s1"].append(scale.reshape(1, c_inter))
        params["b1"].append(bias.reshape(1, c_inter))
    w3 = jax.random.normal(next(keys), (3, 3, c_inter, c_out), jnp.float32) * 0.1
    gamma = jax.random.uniform(next(keys), (c_out,), minval=0.5, maxval=1.5)
    beta = jax.random.normal(next(keys), (c_out,)) * 0.1
    mean = jax.random.normal(next(keys), (c_out,)) * 0.1
    var = jax.random.uniform(next(keys), (c_out,), minval=0.5, maxval=1.5)
    scale, bias = _fold_bn(gamma, beta, mean, var)
    params["w3"] = w3.reshape(9, c_inter, c_out)
    params["s3"] = scale.reshape(1, c_out)
    params["b3"] = bias.reshape(1, c_out)
    return params


# --------------------------- pure-JAX reference check -------------------------

def reference(x_nchw, params, bin_sizes, align_corners):
    N, c_in, H, W = x_nchw.shape
    x = jnp.transpose(x_nchw, (0, 2, 3, 1)).reshape(N, H * W, c_in).astype(jnp.float32)
    u = 0.0
    for k, s in enumerate(bin_sizes):
        P = jnp.asarray(np.kron(_adaptive_pool_matrix(s, H), _adaptive_pool_matrix(s, W)))
        M = jnp.asarray(np.kron(_interp_matrix(H, s, align_corners),
                                _interp_matrix(W, s, align_corners)))
        pooled = jnp.einsum("ph,nhc->npc", P, x)
        a = jnp.maximum(jnp.einsum("npc,cd->npd", pooled, params["w1"][k])
                        * params["s1"][k] + params["b1"][k], 0.0)
        u = u + jnp.einsum("hp,npd->nhd", M, a)
    c_inter = params["w1"][0].shape[1]
    u = u.reshape(N, H, W, c_inter)
    up = jnp.pad(u, ((0, 0), (1, 1), (1, 1), (0, 0)))
    acc = 0.0
    for dy in range(3):
        for dx in range(3):
            acc = acc + jnp.einsum("nhwc,cd->nhwd",
                                   up[:, dy:dy + H, dx:dx + W, :],
                                   params["w3"][dy * 3 + dx])
    y = jnp.maximum(acc * params["s3"] + params["b3"], 0.0)
    return jnp.transpose(y, (0, 3, 1, 2))


# ------------------------------------ main ------------------------------------

if __name__ == "__main__":
    N, C_IN, C_INTER, C_OUT, H, W = 2, 4, 8, 4, 16, 16
    BIN_SIZES = (1, 3)
    ALIGN_CORNERS = False

    key = jax.random.PRNGKey(0)
    kx, kp = jax.random.split(key)
    x = jax.random.normal(kx, (N, C_IN, H, W), jnp.float32)
    params = init_params(kp, C_IN, C_INTER, C_OUT, len(BIN_SIZES))

    out = pp_context_module(x, params, BIN_SIZES, ALIGN_CORNERS)
    out = jax.block_until_ready(out)
    assert out.shape == (N, C_OUT, H, W)

    ref = jax.block_until_ready(reference(x, params, BIN_SIZES, ALIGN_CORNERS))
    # bf16 matmul operands (f32 accumulation) -> ~1e-2-level relative rounding vs the
    # f32 reference, hence the loosened tolerance.
    if not np.allclose(np.asarray(out), np.asarray(ref), rtol=3e-2, atol=3e-2):
        err = np.max(np.abs(np.asarray(out) - np.asarray(ref)))
        raise AssertionError(f"Pallas kernel output mismatch vs JAX reference (max abs err {err})")

    print("KERNEL_OK")
</pallas_src>

<mosaic_0001>
module attributes {stable_mosaic.version = 11 : i64} {
  func.func @kernel(%arg0: i32, %arg1: memref<8x256xbf16, #tpu.memory_space<vmem>>, %arg2: memref<8x4xbf16, #tpu.memory_space<vmem>>, %arg3: memref<8x1xf32, #tpu.memory_space<vmem>>, %arg4: memref<72x9xf32, #tpu.memory_space<vmem>>, %arg5: memref<9x256xbf16, #tpu.memory_space<vmem>>, %arg6: memref<9x256xbf16, #tpu.memory_space<vmem>>, %arg7: memref<9x81xf32, #tpu.memory_space<vmem>>, %arg8: memref<8x4xbf16, #tpu.memory_space<vmem>>, %arg9: memref<8x1xf32, #tpu.memory_space<vmem>>, %arg10: memref<72x81xf32, #tpu.memory_space<vmem>>, %arg11: memref<81x256xbf16, #tpu.memory_space<vmem>>, %arg12: memref<4x72xbf16, #tpu.memory_space<vmem>>, %arg13: memref<8x1xf32, #tpu.memory_space<vmem>>, %arg14: memref<8x256xf32, #tpu.memory_space<vmem>>) attributes {dimension_semantics = [#tpu.dimension_semantics<parallel>], iteration_bounds = array<i64: 1>, scalar_prefetch = 0 : i64, scratch_operands = 0 : i64, tpu.core_type = #tpu.core_type<tc>, window_params = [{transform_indices = @transform_0, window_bounds = array<i64: 8, 256>}, {pipeline_mode = #tpu.pipeline_mode<synchronous>, transform_indices = @transform_1, window_bounds = array<i64: 8, 4>}, {pipeline_mode = #tpu.pipeline_mode<synchronous>, transform_indices = @transform_2, window_bounds = array<i64: 8, 1>}, {pipeline_mode = #tpu.pipeline_mode<synchronous>, transform_indices = @transform_3, window_bounds = array<i64: 72, 9>}, {pipeline_mode = #tpu.pipeline_mode<synchronous>, transform_indices = @transform_4, window_bounds = array<i64: 9, 256>}, {pipeline_mode = #tpu.pipeline_mode<synchronous>, transform_indices = @transform_5, window_bounds = array<i64: 9, 256>}, {pipeline_mode = #tpu.pipeline_mode<synchronous>, transform_indices = @transform_6, window_bounds = array<i64: 9, 81>}, {pipeline_mode = #tpu.pipeline_mode<synchronous>, transform_indices = @transform_7, window_bounds = array<i64: 8, 4>}, {pipeline_mode = #tpu.pipeline_mode<synchronous>, transform_indices = @transform_8, window_bounds = array<i64: 8, 1>}, {pipeline_mode = #tpu.pipeline_mode<synchronous>, transform_indices = @transform_9, window_bounds = array<i64: 72, 81>}, {pipeline_mode = #tpu.pipeline_mode<synchronous>, transform_indices = @transform_10, window_bounds = array<i64: 81, 256>}, {pipeline_mode = #tpu.pipeline_mode<synchronous>, transform_indices = @transform_11, window_bounds = array<i64: 4, 72>}, {pipeline_mode = #tpu.pipeline_mode<synchronous>, transform_indices = @transform_12, window_bounds = array<i64: 8, 1>}, {transform_indices = @transform_13, window_bounds = array<i64: 8, 256>}]} {
    %c0 = arith.constant 0 : index
    %c0_0 = arith.constant 0 : index
    %0 = vector.load %arg1[%c0, %c0_0] : memref<8x256xbf16, #tpu.memory_space<vmem>>, vector<8x256xbf16>
    %c0_1 = arith.constant 0 : index
    %c0_2 = arith.constant 0 : index
    %1 = vector.load %arg12[%c0_1, %c0_2] : memref<4x72xbf16, #tpu.memory_space<vmem>>, vector<4x72xbf16>
    %2 = arith.extf %0 : vector<8x256xbf16> to vector<8x256xf32>
    %cst = arith.constant dense<0.000000e+00> : vector<8xf32>
    %3 = vector.multi_reduction <add>, %2, %cst [1] : vector<8x256xf32> to vector<8xf32>
    %4 = vector.shape_cast %3 : vector<8xf32> to vector<8x1xf32>
    %cst_3 = arith.constant 2.560000e+02 : f32
    %5 = vector.broadcast %cst_3 : f32 to vector<8x1xf32>
    %6 = arith.divf %4, %5 : vector<8x1xf32>
    %7 = arith.truncf %6 : vector<8x1xf32> to vector<8x1xbf16>
    %c0_4 = arith.constant 0 : index
    %c0_5 = arith.constant 0 : index
    %8 = vector.load %arg2[%c0_4, %c0_5] : memref<8x4xbf16, #tpu.memory_space<vmem>>, vector<8x4xbf16>
    %c0_6 = arith.constant 0 : index
    %c0_7 = arith.constant 0 : index
    %9 = vector.load %arg3[%c0_6, %c0_7] : memref<8x1xf32, #tpu.memory_space<vmem>>, vector<8x1xf32>
    %c0_8 = arith.constant 0 : index
    %c0_9 = arith.constant 0 : index
    %10 = vector.load %arg4[%c0_8, %c0_9] : memref<72x9xf32, #tpu.memory_space<vmem>>, vector<72x9xf32>
    %11 = vector.extract_strided_slice %7 {offsets = [0, 0], sizes = [4, 1], strides = [1, 1]} : vector<8x1xbf16> to vector<4x1xbf16>
    %cst_10 = arith.constant dense<0.000000e+00> : vector<8x1xf32>
    %12 = tpu.matmul %8, %11, %cst_10 {dimension_numbers = #tpu.dot_dimension_numbers<[1], [0], [0], [1], [0, 0, 1, 1], [], []>} : vector<8x4xbf16>, vector<4x1xbf16>, vector<8x1xf32> -> vector<8x1xf32>
    %13 = arith.addf %12, %9 : vector<8x1xf32>
    %cst_11 = arith.constant 0.000000e+00 : f32
    %14 = vector.broadcast %cst_11 : f32 to vector<8x1xf32>
    %15 = arith.maximumf %13, %14 : vector<8x1xf32>
    %16 = tpu.concatenate %15, %15, %15, %15, %15, %15, %15, %15, %15 in 0 : vector<8x1xf32>, vector<8x1xf32>, vector<8x1xf32>, vector<8x1xf32>, vector<8x1xf32>, vector<8x1xf32>, vector<8x1xf32>, vector<8x1xf32>, vector<8x1xf32> -> vector<72x1xf32>
    %17 = vector.broadcast %16 : vector<72x1xf32> to vector<72x9xf32>
    %18 = arith.mulf %17, %10 : vector<72x9xf32>
    %19 = arith.truncf %18 : vector<72x9xf32> to vector<72x9xbf16>
    %cst_12 = arith.constant dense<0.000000e+00> : vector<4x9xf32>
    %20 = tpu.matmul %1, %19, %cst_12 {dimension_numbers = #tpu.dot_dimension_numbers<[1], [0], [0], [1], [0, 0, 1, 1], [], []>} : vector<4x72xbf16>, vector<72x9xbf16>, vector<4x9xf32> -> vector<4x9xf32>
    %21 = vector.extract_strided_slice %7 {offsets = [4, 0], sizes = [4, 1], strides = [1, 1]} : vector<8x1xbf16> to vector<4x1xbf16>
    %cst_13 = arith.constant dense<0.000000e+00> : vector<8x1xf32>
    %22 = tpu.matmul %8, %21, %cst_13 {dimension_numbers = #tpu.dot_dimension_numbers<[1], [0], [0], [1], [0, 0, 1, 1], [], []>} : vector<8x4xbf16>, vector<4x1xbf16>, vector<8x1xf32> -> vector<8x1xf32>
    %23 = arith.addf %22, %9 : vector<8x1xf32>
    %cst_14 = arith.constant 0.000000e+00 : f32
    %24 = vector.broadcast %cst_14 : f32 to vector<8x1xf32>
    %25 = arith.maximumf %23, %24 : vector<8x1xf32>
    %26 = tpu.concatenate %25, %25, %25, %25, %25, %25, %25, %25, %25 in 0 : vector<8x1xf32>, vector<8x1xf32>, vector<8x1xf32>, vector<8x1xf32>, vector<8x1xf32>, vector<8x1xf32>, vector<8x1xf32>, vector<8x1xf32>, vector<8x1xf32> -> vector<72x1xf32>
    %27 = vector.broadcast %26 : vector<72x1xf32> to vector<72x9xf32>
    %28 = arith.mulf %27, %10 : vector<72x9xf32>
    %29 = arith.truncf %28 : vector<72x9xf32> to vector<72x9xbf16>
    %cst_15 = arith.constant dense<0.000000e+00> : vector<4x9xf32>
    %30 = tpu.matmul %1, %29, %cst_15 {dimension_numbers = #tpu.dot_dimension_numbers<[1], [0], [0], [1], [0, 0, 1, 1], [], []>} : vector<4x72xbf16>, vector<72x9xbf16>, vector<4x9xf32> -> vector<4x9xf32>
    %31 = tpu.concatenate %20, %30 in 0 : vector<4x9xf32>, vector<4x9xf32> -> vector<8x9xf32>
    %32 = arith.truncf %31 : vector<8x9xf32> to vector<8x9xbf16>
    %c0_16 = arith.constant 0 : index
    %c0_17 = arith.constant 0 : index
    %33 = vector.load %arg5[%c0_16, %c0_17] : memref<9x256xbf16, #tpu.memory_space<vmem>>, vector<9x256xbf16>
    %cst_18 = arith.constant dense<0.000000e+00> : vector<8x256xf32>
    %34 = tpu.matmul %32, %33, %cst_18 {dimension_numbers = #tpu.dot_dimension_numbers<[1], [0], [0], [1], [0, 0, 1, 1], [], []>} : vector<8x9xbf16>, vector<9x256xbf16>, vector<8x256xf32> -> vector<8x256xf32>
    %c0_19 = arith.constant 0 : index
    %c0_20 = arith.constant 0 : index
    %35 = vector.load %arg6[%c0_19, %c0_20] : memref<9x256xbf16, #tpu.memory_space<vmem>>, vector<9x256xbf16>
    %cst_21 = arith.constant dense<0.000000e+00> : vector<8x9xf32>
    %36 = tpu.matmul %0, %35, %cst_21 {dimension_numbers = #tpu.dot_dimension_numbers<[1], [1], [0], [0], [0, 0, 1, 0], [], []>} : vector<8x256xbf16>, vector<9x256xbf16>, vector<8x9xf32> -> vector<8x9xf32>
    %37 = arith.truncf %36 : vector<8x9xf32> to vector<8x9xbf16>
    %c0_22 = arith.constant 0 : index
    %c0_23 = arith.constant 0 : index
    %38 = vector.load %arg8[%c0_22, %c0_23] : memref<8x4xbf16, #tpu.memory_space<vmem>>, vector<8x4xbf16>
    %c0_24 = arith.constant 0 : index
    %c0_25 = arith.constant 0 : index
    %39 = vector.load %arg9[%c0_24, %c0_25] : memref<8x1xf32, #tpu.memory_space<vmem>>, vector<8x1xf32>
    %c0_26 = arith.constant 0 : index
    %c0_27 = arith.constant 0 : index
    %40 = vector.load %arg10[%c0_26, %c0_27] : memref<72x81xf32, #tpu.memory_space<vmem>>, vector<72x81xf32>
    %41 = vector.extract_strided_slice %37 {offsets = [0, 0], sizes = [4, 9], strides = [1, 1]} : vector<8x9xbf16> to vector<4x9xbf16>
    %cst_28 = arith.constant dense<0.000000e+00> : vector<8x9xf32>
    %42 = tpu.matmul %38, %41, %cst_28 {dimension_numbers = #tpu.dot_dimension_numbers<[1], [0], [0], [1], [0, 0, 1, 1], [], []>} : vector<8x4xbf16>, vector<4x9xbf16>, vector<8x9xf32> -> vector<8x9xf32>
    %43 = vector.broadcast %39 : vector<8x1xf32> to vector<8x9xf32>
    %44 = arith.addf %42, %43 : vector<8x9xf32>
    %cst_29 = arith.constant 0.000000e+00 : f32
    %45 = vector.broadcast %cst_29 : f32 to vector<8x9xf32>
    %46 = arith.maximumf %44, %45 : vector<8x9xf32>
    %47 = tpu.concatenate %46, %46, %46, %46, %46, %46, %46, %46, %46 in 0 : vector<8x9xf32>, vector<8x9xf32>, vector<8x9xf32>, vector<8x9xf32>, vector<8x9xf32>, vector<8x9xf32>, vector<8x9xf32>, vector<8x9xf32>, vector<8x9xf32> -> vector<72x9xf32>
    %c0_30 = arith.constant 0 : index
    %c0_31 = arith.constant 0 : index
    %48 = vector.load %arg7[%c0_30, %c0_31] : memref<9x81xf32, #tpu.memory_space<vmem>>, vector<9x81xf32>
    %cst_32 = arith.constant dense<0.000000e+00> : vector<72x81xf32>
    %49 = tpu.matmul %47, %48, %cst_32 {dimension_numbers = #tpu.dot_dimension_numbers<[1], [0], [0], [1], [0, 0, 1, 1], [], []>} : vector<72x9xf32>, vector<9x81xf32>, vector<72x81xf32> -> vector<72x81xf32>
    %50 = arith.mulf %49, %40 : vector<72x81xf32>
    %51 = arith.truncf %50 : vector<72x81xf32> to vector<72x81xbf16>
    %cst_33 = arith.constant dense<0.000000e+00> : vector<4x81xf32>
    %52 = tpu.matmul %1, %51, %cst_33 {dimension_numbers = #tpu.dot_dimension_numbers<[1], [0], [0], [1], [0, 0, 1, 1], [], []>} : vector<4x72xbf16>, vector<72x81xbf16>, vector<4x81xf32> -> vector<4x81xf32>
    %53 = vector.extract_strided_slice %37 {offsets = [4, 0], sizes = [4, 9], strides = [1, 1]} : vector<8x9xbf16> to vector<4x9xbf16>
    %cst_34 = arith.constant dense<0.000000e+00> : vector<8x9xf32>
    %54 = tpu.matmul %38, %53, %cst_34 {dimension_numbers = #tpu.dot_dimension_numbers<[1], [0], [0], [1], [0, 0, 1, 1], [], []>} : vector<8x4xbf16>, vector<4x9xbf16>, vector<8x9xf32> -> vector<8x9xf32>
    %55 = vector.broadcast %39 : vector<8x1xf32> to vector<8x9xf32>
    %56 = arith.addf %54, %55 : vector<8x9xf32>
    %cst_35 = arith.constant 0.000000e+00 : f32
    %57 = vector.broadcast %cst_35 : f32 to vector<8x9xf32>
    %58 = arith.maximumf %56, %57 : vector<8x9xf32>
    %59 = tpu.concatenate %58, %58, %58, %58, %58, %58, %58, %58, %58 in 0 : vector<8x9xf32>, vector<8x9xf32>, vector<8x9xf32>, vector<8x9xf32>, vector<8x9xf32>, vector<8x9xf32>, vector<8x9xf32>, vector<8x9xf32>, vector<8x9xf32> -> vector<72x9xf32>
    %c0_36 = arith.constant 0 : index
    %c0_37 = arith.constant 0 : index
    %60 = vector.load %arg7[%c0_36, %c0_37] : memref<9x81xf32, #tpu.memory_space<vmem>>, vector<9x81xf32>
    %cst_38 = arith.constant dense<0.000000e+00> : vector<72x81xf32>
    %61 = tpu.matmul %59, %60, %cst_38 {dimension_numbers = #tpu.dot_dimension_numbers<[1], [0], [0], [1], [0, 0, 1, 1], [], []>} : vector<72x9xf32>, vector<9x81xf32>, vector<72x81xf32> -> vector<72x81xf32>
    %62 = arith.mulf %61, %40 : vector<72x81xf32>
    %63 = arith.truncf %62 : vector<72x81xf32> to vector<72x81xbf16>
    %cst_39 = arith.constant dense<0.000000e+00> : vector<4x81xf32>
    %64 = tpu.matmul %1, %63, %cst_39 {dimension_numbers = #tpu.dot_dimension_numbers<[1], [0], [0], [1], [0, 0, 1, 1], [], []>} : vector<4x72xbf16>, vector<72x81xbf16>, vector<4x81xf32> -> vector<4x81xf32>
    %65 = tpu.concatenate %52, %64 in 0 : vector<4x81xf32>, vector<4x81xf32> -> vector<8x81xf32>
    %66 = arith.truncf %65 : vector<8x81xf32> to vector<8x81xbf16>
    %c0_40 = arith.constant 0 : index
    %c0_41 = arith.constant 0 : index
    %67 = vector.load %arg11[%c0_40, %c0_41] : memref<81x256xbf16, #tpu.memory_space<vmem>>, vector<81x256xbf16>
    %cst_42 = arith.constant dense<0.000000e+00> : vector<8x256xf32>
    %68 = tpu.matmul %66, %67, %cst_42 {dimension_numbers = #tpu.dot_dimension_numbers<[1], [0], [0], [1], [0, 0, 1, 1], [], []>} : vector<8x81xbf16>, vector<81x256xbf16>, vector<8x256xf32> -> vector<8x256xf32>
    %69 = arith.addf %34, %68 : vector<8x256xf32>
    %c0_43 = arith.constant 0 : index
    %c0_44 = arith.constant 0 : index
    %70 = vector.load %arg13[%c0_43, %c0_44] : memref<8x1xf32, #tpu.memory_space<vmem>>, vector<8x1xf32>
    %71 = vector.broadcast %70 : vector<8x1xf32> to vector<8x256xf32>
    %72 = arith.addf %69, %71 : vector<8x256xf32>
    %cst_45 = arith.constant 0.000000e+00 : f32
    %73 = vector.broadcast %cst_45 : f32 to vector<8x256xf32>
    %74 = arith.maximumf %72, %73 : vector<8x256xf32>
    %c0_46 = arith.constant 0 : index
    %c0_47 = arith.constant 0 : index
    %75 = vector.load %arg14[%c0_46, %c0_47] : memref<8x256xf32, #tpu.memory_space<vmem>>, vector<8x256xf32>
    tpu.vector_store %arg14[%c0_46, %c0_47], %74 {strides = array<i32>} : memref<8x256xf32, #tpu.memory_space<vmem>>, vector<8x256xf32>,
    return
  }
  func.func @transform_0(%arg0: i32) -> (i32, i32) {
    %c0_i32 = arith.constant 0 : i32
    %c0_i32_0 = arith.constant 0 : i32
    return %arg0, %c0_i32 : i32, i32
  }
  func.func @transform_1(%arg0: i32) -> (i32, i32) {
    %c0_i32 = arith.constant 0 : i32
    %c0_i32_0 = arith.constant 0 : i32
    %c0_i32_1 = arith.constant 0 : i32
    return %c0_i32, %c0_i32_0 : i32, i32
  }
  func.func @transform_2(%arg0: i32) -> (i32, i32) {
    %c0_i32 = arith.constant 0 : i32
    %c0_i32_0 = arith.constant 0 : i32
    %c0_i32_1 = arith.constant 0 : i32
    return %c0_i32, %c0_i32_0 : i32, i32
  }
  func.func @transform_3(%arg0: i32) -> (i32, i32) {
    %c0_i32 = arith.constant 0 : i32
    %c0_i32_0 = arith.constant 0 : i32
    %c0_i32_1 = arith.constant 0 : i32
    return %c0_i32, %c0_i32_0 : i32, i32
  }
  func.func @transform_4(%arg0: i32) -> (i32, i32) {
    %c0_i32 = arith.constant 0 : i32
    %c0_i32_0 = arith.constant 0 : i32
    %c0_i32_1 = arith.constant 0 : i32
    return %c0_i32, %c0_i32_0 : i32, i32
  }
  func.func @transform_5(%arg0: i32) -> (i32, i32) {
    %c0_i32 = arith.constant 0 : i32
    %c0_i32_0 = arith.constant 0 : i32
    %c0_i32_1 = arith.constant 0 : i32
    return %c0_i32, %c0_i32_0 : i32, i32
  }
  func.func @transform_6(%arg0: i32) -> (i32, i32) {
    %c0_i32 = arith.constant 0 : i32
    %c0_i32_0 = arith.constant 0 : i32
    %c0_i32_1 = arith.constant 0 : i32
    return %c0_i32, %c0_i32_0 : i32, i32
  }
  func.func @transform_7(%arg0: i32) -> (i32, i32) {
    %c0_i32 = arith.constant 0 : i32
    %c0_i32_0 = arith.constant 0 : i32
    %c0_i32_1 = arith.constant 0 : i32
    return %c0_i32, %c0_i32_0 : i32, i32
  }
  func.func @transform_8(%arg0: i32) -> (i32, i32) {
    %c0_i32 = arith.constant 0 : i32
    %c0_i32_0 = arith.constant 0 : i32
    %c0_i32_1 = arith.constant 0 : i32
    return %c0_i32, %c0_i32_0 : i32, i32
  }
  func.func @transform_9(%arg0: i32) -> (i32, i32) {
    %c0_i32 = arith.constant 0 : i32
    %c0_i32_0 = arith.constant 0 : i32
    %c0_i32_1 = arith.constant 0 : i32
    return %c0_i32, %c0_i32_0 : i32, i32
  }
  func.func @transform_10(%arg0: i32) -> (i32, i32) {
    %c0_i32 = arith.constant 0 : i32
    %c0_i32_0 = arith.constant 0 : i32
    %c0_i32_1 = arith.constant 0 : i32
    return %c0_i32, %c0_i32_0 : i32, i32
  }
  func.func @transform_11(%arg0: i32) -> (i32, i32) {
    %c0_i32 = arith.constant 0 : i32
    %c0_i32_0 = arith.constant 0 : i32
    %c0_i32_1 = arith.constant 0 : i32
    return %c0_i32, %c0_i32_0 : i32, i32
  }
  func.func @transform_12(%arg0: i32) -> (i32, i32) {
    %c0_i32 = arith.constant 0 : i32
    %c0_i32_0 = arith.constant 0 : i32
    %c0_i32_1 = arith.constant 0 : i32
    return %c0_i32, %c0_i32_0 : i32, i32
  }
  func.func @transform_13(%arg0: i32) -> (i32, i32) {
    %c0_i32 = arith.constant 0 : i32
    %c0_i32_0 = arith.constant 0 : i32
    return %arg0, %c0_i32 : i32, i32
  }
}

</mosaic_0001>

<bundles_post_ra>
// kernel: tpu_custom_call.1
= control target key start
LH: loop header
LB: loop body
LE: loop exit
PB: predicated region body
PF: predicated region fallthrough
CT: control target
= control target key end

     0   :  { %18 = vsyncpa [#allocation3], 0  ;;  %s1240_s0 = inlined_call_operand.vmem [shape: bf16[8,256], index: 0, kind: input, shape index: {}]   ;;  %s1241_s1 = inlined_call_operand.vmem [shape: bf16[8,4], index: 1, kind: input, shape index: {}]   ;;  %s1242_s2 = inlined_call_operand.vmem [shape: f32[8,1], index: 2, kind: input, shape index: {}]   ;;  %s1243_s3 = inlined_call_operand.vmem [shape: f32[72,9], index: 3, kind: input, shape index: {}]   ;;  %s1244_s4 = inlined_call_operand.hbm [shape: bf16[9,256], index: 4, kind: input, shape index: {}]   ;;  %s1245_s5 = inlined_call_operand.hbm [shape: bf16[9,256], index: 5, kind: input, shape index: {}]   ;;  %s1246_s6 = inlined_call_operand.hbm [shape: f32[9,81], index: 6, kind: input, shape index: {}]   ;;  %s1247_s7 = inlined_call_operand.vmem [shape: bf16[8,4], index: 7, kind: input, shape index: {}]   ;;  %s1248_s8 = inlined_call_operand.vmem [shape: f32[8,1], index: 8, kind: input, shape index: {}]   ;;  %s1249_s9 = inlined_call_operand.hbm [shape: f32[72,81], index: 9, kind: input, shape index: {}]   ;;  %s1250_s10 = inlined_call_operand.vmem [shape: bf16[81,256], index: 10, kind: input, shape index: {}]   ;;  %s1251_s11 = inlined_call_operand.vmem [shape: bf16[4,72], index: 11, kind: input, shape index: {}]   ;;  %s1252_s12 = inlined_call_operand.vmem [shape: f32[8,1], index: 12, kind: input, shape index: {}]   ;;  %s1253_s13 = inlined_call_operand.hbm [shape: f32[8,256], index: 13, kind: output, shape index: {}]  }
   0x1   :  { %19 = vsyncpa [#allocation6], 0 }
   0x2   :  { %20 = vsyncpa [#allocation9], 0 }
   0x3   :  { %21 = vsyncpa [#allocation4], 0  ;;  %s47_s27 = sshll.u32 %s1245_s5, 4  ;;  %s956_s28 = smov [#allocation5]   ;;  %s48_s27 = int_to_ptr.hbm [resolvable:$true] %s47_s27 }
   0x4   :  { %s49_s29 = sshll.u32 %s956_s28, 4  ;;  %s34_s15 = sshll.u32 %s1244_s4, 4  ;;  %s50_s29 = int_to_ptr.vmem [resolvable:$true] %s49_s29  ;;  %s35_s15 = int_to_ptr.hbm [resolvable:$true] %s34_s15 }
   0x5   :  { %s957_s16 = smov 128   ;;  %s958_s17 = smov 8  }
   0x6   :  { %55 = dma.hbm_to_vmem [thread:$0]  %s48_s27, 256, %s50_s29, [#allocation6], %s957_s16, %s957_s16, %s958_s17  }
   0x7   :  { %s959_s18 = smov [#allocation2]   ;;  %s60_s22 = sshll.u32 %s1246_s6, 4  ;;  %s61_s22 = int_to_ptr.hbm [resolvable:$true] %s60_s22 }
   0x8   :  { %s36_s19 = sshll.u32 %s959_s18, 4  ;;  %s77_s24 = sshll.u32 %s1249_s9, 4  ;;  %s37_s19 = int_to_ptr.vmem [resolvable:$true] %s36_s19  ;;  %s78_s24 = int_to_ptr.hbm [resolvable:$true] %s77_s24 }
   0x9   :  { %42 = dma.hbm_to_vmem [thread:$0]  %s35_s15, 256, %s37_s19, [#allocation3], %s957_s16, %s957_s16, %s958_s17  }
   0xa   :  { %s960_s25 = smov [#allocation7]   ;;  %s961_s4 = smov [#allocation8]  }
   0xb   :  { %s62_s26 = sshll.u32 %s960_s25, 4  ;;  %s79_s27 = sshll.u32 %s961_s4, 4  ;;  %s63_s26 = int_to_ptr.vmem [resolvable:$true] %s62_s26  ;;  %s80_s27 = int_to_ptr.vmem [resolvable:$true] %s79_s27 }
   0xc   :  { %68 = dma.hbm_to_vmem [thread:$0]  %s61_s22, 256, %s63_s26, [#allocation6], %s957_s16, %s957_s16, %s958_s17  }
   0xd   :  { %85 = dma.hbm_to_vmem [thread:$0]  %s78_s24, 1152, %s80_s27, [#allocation9], %s957_s16, %s957_s16, %s958_s17  }
   0xe   :  { %948 = dma.done.wait [#allocation3], 256  }
   0xf   :  { %949 = vsyncadd [#allocation3], 4294967040 }
  0x10   :  { %950 = dma.done.wait [#allocation6], 512  }
  0x11   :  { %951 = vsyncadd [#allocation6], 4294966784 }
  0x12   :  { %952 = dma.done.wait [#allocation9], 1152  }
  0x13   :  { %953 = vsyncadd [#allocation9], 4294966144  ;;  %v109_v0 = vld [vmem:[%s1240_s0] sm:$0xff]  ;;  %v962_v4 = vmov 256.0   ;;  %v717_v7 = vld [vmem:[#allocation5] sm:$0xf] }
  0x14   :  { %v111_v1 = vunpack.c.l.bf16 %v109_v0  ;;  %v112_v2 = vunpack.c.h.bf16 %v109_v0  ;;  %826 = vrcp.f32 %v962_v4  ;;  %v802_v8 = vld [vmem:[#allocation5 + $0x4] sm:$0x10]  ;;  %v264_v14 = vunpack.c.l.b16 %v109_v0  ;;  %v801_v21 = vld [vmem:[#allocation5 + $0x4] sm:$0xf]  ;;  %v719_v22 = vld [vmem:[#allocation5 + $0x8] sm:$0x10] }
  0x15   :  { %v718_v9 = vor.u32 %v802_v8, %v717_v7  ;;  %vm140_vm1 = vcmask 1041408   ;;  %v125_v24 = vld [vmem:[%s1241_s1] sm:$0xf]  ;;  %vm136_vm2 = vcmask 31744   ;;  %v722_v26 = vor.u32 %v801_v21, %v719_v22  ;;  %v133_v51 = vld [vmem:[%s1243_s3 + $0x30] sm:$0xff]  ;;  %v134_v52 = vld [vmem:[%s1243_s3 + $0x38] sm:$0xff] }
  0x16   :  { %v113_v3 = vadd.f32 %v112_v2, %v111_v1  ;;  %v266_v17 = vpack.c.b16 %v264_v14, %v264_v14  ;;  %v265_v28 = vunpack.c.h.b16 %v109_v0  ;;  %v963_v30 = vmov 0   ;;  %v126_v33 = vld [vmem:[%s1242_s2] sm:$0xff]  ;;  %v132_v59 = vld [vmem:[%s1243_s3 + $0x28] sm:$0xff]  ;;  %v129_v1 = vld [vmem:[%s1243_s3 + $0x10] sm:$0xff]  ;;  %s699_s23 = sshll.u32 %s1253_s13, 4  ;;  %s700_s23 = int_to_ptr.hbm [resolvable:$true] %s699_s23 }
  0x17   :  { %287 = vmatpush.bf16.xpose.msra.mxu0 %v718_v9  ;;  %823 = vset.pattern.permute.xlu0 %v963_v30  ;;  %v308_v41 = vld [vmem:[%s1248_s8] sm:$0xff]  ;;  %vm181_vm3 = vcmask 1043456   ;;  %vm349_vm4 = vcmask 1040384   ;;  %vm177_vm5 = vcmask 588800   ;;  %vm345_vm6 = vcmask 72704  }
  0x18   :  { %114 = vadd.xlane.f32.xlu0 %v113_v3  ;;  %v267_v29 = vpack.c.b16 %v265_v28, %v265_v28  ;;  %824 = vset.pattern.permute.xlu1 %v963_v30  ;;  %v1071_v47 = vld [vmem:[%s1247_s7] sm:$0xf]  ;;  %v130_v3 = vld [vmem:[%s1243_s3 + $0x18] sm:$0xff]  ;;  %vm645_vm7 = vcmask 1044480   ;;  %vm596_vm8 = vcmask 662528  }
  0x19   :  { %825 = vset.pattern.permute.xlu2 %v963_v30  ;;  %v135_v49 = vld [vmem:[%s1243_s3 + $0x40] sm:$0xff] }
  0x1a   :  { %v827_v5 = vpop.eup %826  ;;  %v131_v58 = vld [vmem:[%s1243_s3 + $0x20] sm:$0xff] }
  0x1b   :  { %v117_v6 = vmul.f32 256.0, %v827_v5  ;;  %vm121_vm0 = vweird.f32 %v827_v5 }
  0x1d   :  { %v118_v10 = vsub.f32 1.0, %v117_v6 }
  0x1e   :  { %288 = vmatmul.bf16.vlgmr.msra.gmra.mxu0 %v266_v17 }
  0x1f   :  { %v119_v11 = vmul.f32 %v827_v5, %v118_v10  ;;  %v127_v10 = vld [vmem:[%s1243_s3] sm:$0xff] }
  0x21   :  { %v120_v12 = vadd.f32 %v827_v5, %v119_v11  ;;  %v128_v11 = vld [vmem:[%s1243_s3 + $0x8] sm:$0xff] }
  0x23   :  { %v122_v13 = vsel %vm121_vm0, %v827_v5, %v120_v12 }
  0x8b   :  { %v115_v15 = vpop.xlane.xlu0 %114 }
  0x8c   :  { %v123_v16 = vmul.f32 %v122_v13, %v115_v15 }
  0x8e   :  { %v124_v18 = vpack.c.bf16 %v123_v16, %v123_v16 }
  0x90   :  { %v142_v19 = vsel %vm140_vm1, %v124_v18, 0  ;;  %v199_v20 = vunpack.c.l.b16 %v124_v18 }
  0x91   :  { %151 = vmatpush.bf16.msra.mxu3 %v142_v19  ;;  %v344_v19 = vld [vmem:[#allocation7 + $0x8] sm:$0x1] }
  0x92   :  { %v200_v23 = vpack.c.b16 %v199_v20, %v199_v20  ;;  %v1107_v20 = vld [vmem:[%s1250_s10 + $0x50] sm:$0x11] }
  0x93   :  { %v573_v21 = vunpack.c.h.b16 %v1107_v20 }
  0x94   :  { %v201_v25 = vrot.slane %v200_v23, 2  ;;  %711 = vmatmul.msk.bf16.vlgmr.msra.gmra.mxu3 %vm136_vm2, %v125_v24 }
  0x96   :  { %v203_v27 = vsel %vm140_vm1, %v201_v25, 0  ;;  %v1113_v25 = vsel %vm349_vm4, 65535, %v963_v30  ;;  %v1123_v30 = vld [vmem:[%s1251_s11] sm:$0x3] }
  0x97   :  { %212 = vmatpush.bf16.msra.mxu2 %v203_v27 }
  0x9a   :  { %713 = vmatmul.msk.bf16.vlgmr.msra.gmra.mxu2 %vm136_vm2, %v125_v24 }
  0x9b   :  { %300 = vmatpush.bf16.xpose.msrb.mxu2 %v722_v26  ;;  %v289_v31 = vpop.f32.mrf.mxu0  ;;  %v343_v26 = vld [vmem:[#allocation7] sm:$0xff] }
  0xa3   :  { %v291_v32 = vpop.f32.mrf.mxu0 }
  0xaa   :  { %301 = vmatmul.bf16.vlgmr.msrb.gmra.mxu2 %v267_v29  ;;  %v1115_v29 = vpack.c.b16 %v573_v21, %v573_v21 }
 0x117   :  { %v153_v34 = vpop.f32.mrf.mxu3 }
 0x118   :  { %v154_v35 = vadd.f32 %v153_v34, %v126_v33 }
 0x11a   :  { %v157_v36 = vmax.f32 %v154_v35, 0.0 }
 0x11c   :  { %160 = vperm.xlu1 %824, %v157_v36  }
 0x11d   :  { %v214_v37 = vpop.f32.mrf.mxu2 }
 0x11e   :  { %v215_v38 = vadd.f32 %v214_v37, %v126_v33 }
 0x11f   :  { %v155_v39 = vpop.f32.mrf.mxu3 }
 0x120   :  { %v218_v40 = vmax.f32 %v215_v38, 0.0 }
 0x122   :  { %221 = vperm.xlu0 %823, %v218_v40  }
 0x124   :  { %320 = vperm.xlu1 %824, %v308_v41  }
 0x125   :  { %v216_v42 = vpop.f32.mrf.mxu2 }
 0x12d   :  { %v302_v43 = vpop.f32.mrf.mxu2 }
 0x12e   :  { %v303_v44 = vadd.f32 %v302_v43, %v289_v31  ;;  %v606_v31 = vand.u32 %v1113_v25, %v1115_v29  ;;  %v767_v29 = vld [vmem:[%s1250_s10 + $0x28] sm:$0xf0] }
 0x130   :  { %v306_v45 = vpack.c.bf16 %v303_v44, %v303_v44 }
 0x132   :  { %v327_v46 = vsel %vm140_vm1, %v306_v45, 0  ;;  %v428_v12 = vunpack.c.l.b16 %v306_v45 }
 0x133   :  { %336 = vmatpush.bf16.msrb.mxu0 %v327_v46 }
 0x134   :  { %v429_v22 = vpack.c.b16 %v428_v12, %v428_v12 }
 0x135   :  { %v304_v48 = vpop.f32.mrf.mxu2 }
 0x136   :  { %723 = vmatmul.msk.bf16.vlgmr.msrb.gmra.mxu0 %vm136_vm2, %v1071_v47  ;;  %v430_v32 = vrot.slane %v429_v22, 2  ;;  %v572_v22 = vunpack.c.l.b16 %v1107_v20 }
 0x137   :  { %736 = vmatpush.msk.msra.mxu0 %vm349_vm4, %v344_v19 }
 0x138   :  { %v432_v37 = vsel %vm140_vm1, %v430_v32, 0 }
 0x139   :  { %466 = vmatpush.msra.mxu0 %v343_v26 }
 0x18e   :  { %v161_v50 = vpop.permute.xlu1 %160 }
 0x18f   :  { %v171_v53 = vmul.f32 %v161_v50, %v135_v49  ;;  %v169_v54 = vmul.f32 %v161_v50, %v133_v51  ;;  %v170_v55 = vmul.f32 %v161_v50, %v134_v52  ;;  %v167_v62 = vmul.f32 %v161_v50, %v131_v58 }
 0x190   :  { %v168_v63 = vmul.f32 %v161_v50, %v132_v59  ;;  %v165_v4 = vmul.f32 %v161_v50, %v129_v1  ;;  %v166_v8 = vmul.f32 %v161_v50, %v130_v3  ;;  %v163_v13 = vmul.f32 %v161_v50, %v127_v10 }
 0x191   :  { %v176_v56 = vpack.c.bf16 %v171_v53, %v171_v53  ;;  %v175_v61 = vpack.c.bf16 %v170_v55, %v169_v54  ;;  %v164_v14 = vmul.f32 %v161_v50, %v128_v11  ;;  %v309_v50 = vld [vmem:[#allocation8] sm:$0xff] }
 0x192   :  { %v174_v7 = vpack.c.bf16 %v168_v63, %v167_v62  ;;  %v173_v18 = vpack.c.bf16 %v166_v8, %v165_v4  ;;  %v316_v4 = vld [vmem:[#allocation8 + $0x38] sm:$0xff] }
 0x193   :  { %v183_v57 = vsel %vm181_vm3, %v176_v56, 0  ;;  %v172_v24 = vpack.c.bf16 %v164_v14, %v163_v13 }
 0x194   :  { %v222_v60 = vpop.permute.xlu0 %221  ;;  %188 = vmatpush.bf16.msra.mxu1 %v183_v57 }
 0x195   :  { %v232_v0 = vmul.f32 %v222_v60, %v135_v49  ;;  %v230_v5 = vmul.f32 %v222_v60, %v133_v51  ;;  %v231_v6 = vmul.f32 %v222_v60, %v134_v52  ;;  %v228_v16 = vmul.f32 %v222_v60, %v131_v58  ;;  %v310_v51 = vld [vmem:[#allocation8 + $0x8] sm:$0xff] }
 0x196   :  { %v229_v17 = vmul.f32 %v222_v60, %v132_v59  ;;  %v226_v23 = vmul.f32 %v222_v60, %v129_v1  ;;  %v227_v28 = vmul.f32 %v222_v60, %v130_v3  ;;  %v224_v34 = vmul.f32 %v222_v60, %v127_v10  ;;  %v321_v38 = vpop.permute.xlu1 %320  ;;  %v1150_v3 = vld [vmem:[#allocation8 + $0x30] sm:$0xff]  ;;  %v314_v10 = vld [vmem:[#allocation8 + $0x28] sm:$0xff] }
 0x197   :  { %v237_v2 = vpack.c.bf16 %v232_v0, %v232_v0  ;;  %v236_v15 = vpack.c.bf16 %v231_v6, %v230_v5  ;;  %v225_v35 = vmul.f32 %v222_v60, %v128_v11 }
 0x198   :  { %189 = vmatpush.bf16.msra.mxu1 %v175_v61  ;;  %v235_v27 = vpack.c.bf16 %v229_v17, %v228_v16  ;;  %v234_v33 = vpack.c.bf16 %v227_v28, %v226_v23  ;;  %v311_v16 = vld [vmem:[#allocation8 + $0x10] sm:$0xff]  ;;  %v312_v17 = vld [vmem:[#allocation8 + $0x18] sm:$0xff] }
 0x199   :  { %v239_v9 = vsel %vm181_vm3, %v237_v2, 0  ;;  %v233_v36 = vpack.c.bf16 %v225_v35, %v224_v34  ;;  %v317_v2 = vld [vmem:[#allocation8 + $0x40] sm:$0xff] }
 0x19a   :  { %244 = vmatpush.bf16.msrb.mxu3 %v239_v9  ;;  %v313_v9 = vld [vmem:[#allocation8 + $0x20] sm:$0xff] }
 0x19c   :  { %190 = vmatpush.bf16.msra.mxu1 %v174_v7 }
 0x19e   :  { %245 = vmatpush.bf16.msrb.mxu3 %v236_v15 }
 0x1a0   :  { %191 = vmatpush.bf16.msra.mxu1 %v173_v18 }
 0x1a2   :  { %246 = vmatpush.bf16.msrb.mxu3 %v235_v27 }
 0x1a4   :  { %192 = vmatpush.bf16.msra.mxu1 %v172_v24  ;;  %v584_v24 = vpack.c.b16 %v572_v22, %v572_v22  ;;  %v964_v22 = vmov 65535  }
 0x1a6   :  { %247 = vmatpush.bf16.msrb.mxu3 %v234_v33 }
 0x1a7   :  { %712 = vmatmul.msk.bf16.vlgmr.msra.gmra.mxu1 %vm177_vm5, %v1123_v30 }
 0x1a8   :  { %724 = vmatpush.msk.msrb.mxu1 %vm349_vm4, %v344_v19 }
 0x1aa   :  { %368 = vmatpush.msrb.mxu1 %v343_v26  ;;  %248 = vmatpush.bf16.msrb.mxu3 %v233_v36  ;;  %v603_v26 = vand.u32 %v1113_v25, %v584_v24  ;;  %v807_v25 = vld [vmem:[%s1250_s10 + $0x24] sm:$0xf] }
 0x1ad   :  { %714 = vmatmul.msk.bf16.vlgmr.msrb.gmra.mxu3 %vm177_vm5, %v1123_v30 }
 0x1ae   :  { %441 = vmatpush.bf16.msra.mxu3 %v432_v37 }
 0x1b3   :  { %v338_v39 = vpop.f32.mrf.mxu0 }
 0x1b4   :  { %v339_v40 = vadd.f32 %v338_v39, %v321_v38 }
 0x1b6   :  { %v342_v41 = vmax.f32 %v339_v40, 0.0  ;;  %v781_v40 = vld [vmem:[%s1250_s10 + $0x40] sm:$0xf] }
 0x1b8   :  { %725 = vmatmul.msk.f32.vlgmr.msrb.gmra.mxu1 %vm345_vm6, %v342_v41 }
 0x1bb   :  { %v340_v42 = vpop.f32.mrf.mxu0 }
 0x1bd   :  { %735 = vmatmul.msk.bf16.vlgmr.msra.gmra.mxu3 %vm136_vm2, %v1071_v47 }
 0x1c0   :  { %726 = vmatmul.msk.f32.gmra.mxu1 %vm345_vm6, %v342_v41 }
 0x1c8   :  { %727 = vmatmul.msk.f32.gmra.mxu1 %vm345_vm6, %v342_v41 }
 0x1d0   :  { %728 = vmatmul.msk.f32.gmra.mxu1 %vm345_vm6, %v342_v41 }
 0x1d8   :  { %729 = vmatmul.msk.f32.gmra.mxu1 %vm345_vm6, %v342_v41 }
 0x1e0   :  { %730 = vmatmul.msk.f32.gmra.mxu1 %vm345_vm6, %v342_v41 }
 0x1e8   :  { %731 = vmatmul.msk.f32.gmra.mxu1 %vm345_vm6, %v342_v41 }
 0x1f0   :  { %732 = vmatmul.msk.f32.gmra.mxu1 %vm345_vm6, %v342_v41 }
 0x1f8   :  { %733 = vmatmul.msk.f32.gmra.mxu1 %vm345_vm6, %v342_v41  ;;  %v812_v41 = vld [vmem:[%s1250_s10 + $0x44] sm:$0xf0] }
 0x1f9   :  { %v782_v42 = vor.u32 %v812_v41, %v781_v40 }
 0x224   :  { %v194_v43 = vpop.f32.mrf.mxu1 }
 0x22c   :  { %v196_v44 = vpop.f32.mrf.mxu1 }
 0x22d   :  { %v810_v44 = vld [vmem:[%s1250_s10 + $0x34] sm:$0xf0] }
 0x230   :  { %v250_v45 = vpop.f32.mrf.mxu3 }
 0x231   :  { %v255_v46 = vrot.slane %v250_v45, 4 }
 0x233   :  { %v1142_v47 = vsel %vm181_vm3, %v194_v43, %v255_v46  ;;  %v773_v43 = vld [vmem:[%s1250_s10 + $0x30] sm:$0xf]  ;;  %v765_v46 = vld [vmem:[%s1250_s10 + $0x20] sm:$0xf] }
 0x234   :  { %v774_v45 = vor.u32 %v810_v44, %v773_v43 }
 0x235   :  { %v370_v48 = vpop.f32.mrf.mxu1 }
 0x236   :  { %v397_v52 = vmul.f32 %v370_v48, %v309_v50  ;;  %v808_v48 = vld [vmem:[%s1250_s10 + $0x24] sm:$0xf0] }
 0x238   :  { %v252_v49 = vpop.f32.mrf.mxu3 }
 0x23d   :  { %v373_v53 = vpop.f32.mrf.mxu1 }
 0x23e   :  { %v398_v54 = vmul.f32 %v373_v53, %v310_v51  ;;  %v757_v53 = vld [vmem:[%s1250_s10 + $0x10] sm:$0xf] }
 0x240   :  { %v443_v55 = vpop.f32.mrf.mxu3  ;;  %v406_v56 = vpack.c.bf16 %v398_v54, %v397_v52  ;;  %v806_v54 = vld [vmem:[%s1250_s10 + $0x14] sm:$0xf0] }
 0x241   :  { %v444_v57 = vadd.f32 %v443_v55, %v321_v38 }
 0x243   :  { %v447_v58 = vmax.f32 %v444_v57, 0.0 }
 0x245   :  { %737 = vmatmul.msk.f32.vlgmr.msra.gmra.mxu0 %vm345_vm6, %v447_v58  ;;  %v376_v59 = vpop.f32.mrf.mxu1 }
 0x246   :  { %v399_v18 = vmul.f32 %v376_v59, %v311_v16 }
 0x248   :  { %v445_v60 = vpop.f32.mrf.mxu3 }
 0x24d   :  { %738 = vmatmul.msk.f32.gmra.mxu0 %vm345_vm6, %v447_v58  ;;  %v379_v61 = vpop.f32.mrf.mxu1 }
 0x24e   :  { %v400_v19 = vmul.f32 %v379_v61, %v312_v17 }
 0x250   :  { %v407_v23 = vpack.c.bf16 %v400_v19, %v399_v18  ;;  %v791_v18 = vld [vmem:[#allocation2] sm:$0xf]  ;;  %v800_v19 = vld [vmem:[#allocation2 + $0x4] sm:$0x10] }
 0x255   :  { %739 = vmatmul.msk.f32.gmra.mxu0 %vm345_vm6, %v447_v58  ;;  %v382_v62 = vpop.f32.mrf.mxu1 }
 0x256   :  { %v401_v13 = vmul.f32 %v382_v62, %v313_v9 }
 0x25d   :  { %740 = vmatmul.msk.f32.gmra.mxu0 %vm345_vm6, %v447_v58  ;;  %v385_v63 = vpop.f32.mrf.mxu1 }
 0x25e   :  { %v402_v14 = vmul.f32 %v385_v63, %v314_v10 }
 0x260   :  { %v408_v21 = vpack.c.bf16 %v402_v14, %v401_v13  ;;  %v804_v13 = vld [vmem:[%s1250_s10 + $0x4] sm:$0xf0]  ;;  %v803_v14 = vld [vmem:[%s1250_s10 + $0x4] sm:$0xf] }
 0x265   :  { %741 = vmatmul.msk.f32.gmra.mxu0 %vm345_vm6, %v447_v58  ;;  %v388_v0 = vpop.f32.mrf.mxu1 }
 0x266   :  { %v403_v7 = vmul.f32 %v388_v0, %v1150_v3 }
 0x26d   :  { %742 = vmatmul.msk.f32.gmra.mxu0 %vm345_vm6, %v447_v58  ;;  %v391_v1 = vpop.f32.mrf.mxu1 }
 0x26e   :  { %v404_v8 = vmul.f32 %v391_v1, %v316_v4 }
 0x270   :  { %v409_v15 = vpack.c.bf16 %v404_v8, %v403_v7  ;;  %v809_v7 = vld [vmem:[%s1250_s10 + $0x34] sm:$0xf]  ;;  %v775_v8 = vld [vmem:[%s1250_s10 + $0x38] sm:$0xf0] }
 0x275   :  { %743 = vmatmul.msk.f32.gmra.mxu0 %vm345_vm6, %v447_v58  ;;  %v394_v5 = vpop.f32.mrf.mxu1 }
 0x276   :  { %v405_v6 = vmul.f32 %v394_v5, %v317_v2 }
 0x278   :  { %v410_v11 = vpack.c.bf16 %v405_v6, %v405_v6 }
 0x27a   :  { %v412_v12 = vsel %vm181_vm3, %v410_v11, 0 }
 0x27b   :  { %417 = vmatpush.bf16.msra.mxu2 %v412_v12  ;;  %v749_v12 = vld [vmem:[%s1250_s10] sm:$0xf] }
 0x27d   :  { %744 = vmatmul.msk.f32.gmra.mxu0 %vm345_vm6, %v447_v58 }
 0x27f   :  { %418 = vmatpush.bf16.msra.mxu2 %v409_v15  ;;  %v750_v15 = vor.u32 %v804_v13, %v749_v12 }
 0x283   :  { %419 = vmatpush.bf16.msra.mxu2 %v408_v21  ;;  %v792_v21 = vor.u32 %v800_v19, %v791_v18 }
 0x285   :  { %745 = vmatmul.msk.f32.gmra.mxu0 %vm345_vm6, %v447_v58 }
 0x287   :  { %420 = vmatpush.bf16.msra.mxu2 %v407_v23  ;;  %v646_v23 = vsel %vm181_vm3, 4294967295, %v964_v22 }
 0x288   :  { %v647_v24 = vsel %vm645_vm7, %v646_v23, 0 }
 0x28b   :  { %421 = vmatpush.bf16.msra.mxu2 %v406_v56  ;;  %v758_v56 = vor.u32 %v806_v54, %v757_v53 }
 0x28e   :  { %734 = vmatmul.msk.bf16.vlgmr.msra.gmra.mxu2 %vm177_vm5, %v1123_v30 }
 0x28f   :  { %610 = vmatpush.bf16.msrb.mxu2 %v603_v26  ;;  %v649_v26 = vand.u32 %v792_v21, %v647_v24 }
 0x293   :  { %611 = vmatpush.bf16.msrb.mxu2 %v782_v42 }
 0x297   :  { %612 = vmatpush.bf16.msrb.mxu2 %v774_v45 }
 0x2c2   :  { %v468_v27 = vpop.f32.mrf.mxu0 }
 0x2c3   :  { %v495_v32 = vmul.f32 %v468_v27, %v309_v50  ;;  %v766_v50 = vor.u32 %v808_v48, %v765_v46  ;;  %v799_v27 = vld [vmem:[#allocation2 + $0x4] sm:$0xf] }
 0x2c5   :  { %613 = vmatpush.bf16.msrb.mxu2 %v766_v50 }
 0x2c9   :  { %614 = vmatpush.bf16.msrb.mxu2 %v758_v56 }
 0x2ca   :  { %v471_v28 = vpop.f32.mrf.mxu0 }
 0x2cb   :  { %v496_v33 = vmul.f32 %v471_v28, %v310_v51  ;;  %v793_v28 = vld [vmem:[#allocation2 + $0x8] sm:$0x10] }
 0x2cd   :  { %v504_v34 = vpack.c.bf16 %v496_v33, %v495_v32  ;;  %615 = vmatpush.bf16.msrb.mxu2 %v750_v15  ;;  %v796_v32 = vor.u32 %v799_v27, %v793_v28 }
 0x2d1   :  { %661 = vmatpush.bf16.msra.mxu2 %v649_v26 }
 0x2d2   :  { %v474_v35 = vpop.f32.mrf.mxu0 }
 0x2d3   :  { %v497_v0 = vmul.f32 %v474_v35, %v311_v16  ;;  %v751_v16 = vld [vmem:[%s1250_s10 + $0x8] sm:$0xf0] }
 0x2da   :  { %v477_v20 = vpop.f32.mrf.mxu0 }
 0x2db   :  { %v498_v62 = vmul.f32 %v477_v20, %v312_v17  ;;  %v754_v17 = vor.u32 %v803_v14, %v751_v16  ;;  %v652_v20 = vand.u32 %v796_v32, %v647_v24 }
 0x2e2   :  { %v480_v36 = vpop.f32.mrf.mxu0 }
 0x2e3   :  { %v499_v61 = vmul.f32 %v480_v36, %v313_v9  ;;  %v778_v9 = vor.u32 %v809_v7, %v775_v8 }
 0x2ea   :  { %v483_v37 = vpop.f32.mrf.mxu0 }
 0x2eb   :  { %v500_v59 = vmul.f32 %v483_v37, %v314_v10  ;;  %v805_v10 = vld [vmem:[%s1250_s10 + $0x14] sm:$0xf]  ;;  %v680_v37 = vld [vmem:[%s1252_s12] sm:$0xff]  ;;  %s965_s12 = smov [#allocation10]  }
 0x2ec   :  { %683 = vperm.xlu2 %825, %v680_v37   ;;  %s697_s21 = sshll.u32 %s965_s12, 4  ;;  %s698_s21 = int_to_ptr.vmem [resolvable:$true] %s697_s21 }
 0x2ed   :  { %v506_v63 = vpack.c.bf16 %v500_v59, %v499_v61 }
 0x2f2   :  { %v486_v38 = vpop.f32.mrf.mxu0 }
 0x2f3   :  { %v501_v58 = vmul.f32 %v486_v38, %v1150_v3  ;;  %v783_v3 = vld [vmem:[%s1250_s10 + $0x48] sm:$0xf0] }
 0x2fa   :  { %v489_v39 = vpop.f32.mrf.mxu0 }
 0x2fb   :  { %v502_v55 = vmul.f32 %v489_v39, %v316_v4  ;;  %v811_v4 = vld [vmem:[%s1250_s10 + $0x44] sm:$0xf]  ;;  %v258_v39 = vpack.c.bf16 %v1142_v47, %v1142_v47 }
 0x2fc   :  { %v786_v5 = vor.u32 %v811_v4, %v783_v3 }
 0x2fd   :  { %v507_v60 = vpack.c.bf16 %v502_v55, %v501_v58 }
 0x302   :  { %v492_v49 = vpop.f32.mrf.mxu0 }
 0x303   :  { %v503_v51 = vmul.f32 %v492_v49, %v317_v2  ;;  %v505_v2 = vpack.c.bf16 %v498_v62, %v497_v0 }
 0x305   :  { %v508_v52 = vpack.c.bf16 %v503_v51, %v503_v51 }
 0x307   :  { %v510_v57 = vsel %vm181_vm3, %v508_v52, 0 }
 0x308   :  { %515 = vmatpush.bf16.msrb.mxu3 %v510_v57 }
 0x30c   :  { %516 = vmatpush.bf16.msrb.mxu3 %v507_v60 }
 0x310   :  { %517 = vmatpush.bf16.msrb.mxu3 %v506_v63 }
 0x311   :  { %v423_v1 = vpop.f32.mrf.mxu2 }
 0x314   :  { %518 = vmatpush.bf16.msrb.mxu3 %v505_v2 }
 0x318   :  { %519 = vmatpush.bf16.msrb.mxu3 %v504_v34 }
 0x319   :  { %v425_v6 = vpop.f32.mrf.mxu2 }
 0x31b   :  { %746 = vmatmul.msk.bf16.vlgmr.msrb.gmra.mxu3 %vm177_vm5, %v1123_v30  ;;  %v759_v30 = vld [vmem:[%s1250_s10 + $0x18] sm:$0xf0] }
 0x31c   :  { %623 = vmatpush.bf16.msra.mxu3 %v606_v31  ;;  %v770_v31 = vor.u32 %v807_v25, %v767_v29  ;;  %v762_v11 = vor.u32 %v805_v10, %v759_v30 }
 0x320   :  { %624 = vmatpush.bf16.msra.mxu3 %v786_v5 }
 0x324   :  { %625 = vmatpush.bf16.msra.mxu3 %v778_v9 }
 0x328   :  { %626 = vmatpush.bf16.msra.mxu3 %v770_v31 }
 0x32c   :  { %627 = vmatpush.bf16.msra.mxu3 %v762_v11 }
 0x330   :  { %628 = vmatpush.bf16.msra.mxu3 %v754_v17 }
 0x346   :  { %v684_v45 = vpop.permute.xlu2 %683 }
 0x39e   :  { %v521_v33 = vpop.f32.mrf.mxu3 }
 0x39f   :  { %v526_v34 = vrot.slane %v521_v33, 4 }
 0x3a1   :  { %v528_v35 = vsel %vm181_vm3, %v423_v1, %v526_v34 }
 0x3a2   :  { %v529_v36 = vpack.c.bf16 %v528_v35, %v528_v35 }
 0x3a4   :  { %787 = vmatmul.msk.bf16.vlgmr.msrb.gmra.mxu2 %vm596_vm8, %v529_v36  ;;  %788 = vmatmul.msk.bf16.vlgmr.msra.gmra.mxu3 %vm596_vm8, %v529_v36 }
 0x3a5   :  { %674 = vmatpush.bf16.msrb.mxu2 %v652_v20 }
 0x3a6   :  { %v523_v38 = vpop.f32.mrf.mxu3 }
 0x3b4   :  { %797 = vmatmul.msk.bf16.vlgmr.msra.gmra.mxu2 %vm345_vm6, %v258_v39 }
 0x3c4   :  { %798 = vmatmul.msk.bf16.vlgmr.msrb.gmra.mxu2 %vm345_vm6, %v258_v39 }
 0x427   :  { %v617_v40 = vpop.f32.mrf.mxu2  ;;  %v630_v41 = vpop.f32.mrf.mxu3 }
 0x42f   :  { %v619_v42 = vpop.f32.mrf.mxu2  ;;  %v632_v43 = vpop.f32.mrf.mxu3 }
 0x437   :  { %v663_v44 = vpop.f32.mrf.mxu2 }
 0x438   :  { %v664_v46 = vadd.f32 %v663_v44, %v617_v40 }
 0x43a   :  { %v686_v48 = vadd.f32 %v684_v45, %v664_v46 }
 0x43c   :  { %v688_v49 = vmax.f32 %v686_v48, 0.0 }
 0x43e   :  { %690 = vst [vmem:[#allocation10] sm:$0xff] %v688_v49 }
 0x43f   :  { %v665_v50 = vpop.f32.mrf.mxu2 }
 0x447   :  { %v676_v51 = vpop.f32.mrf.mxu2 }
 0x448   :  { %v677_v52 = vadd.f32 %v676_v51, %v630_v41 }
 0x44a   :  { %v687_v47 = vadd.f32 %v684_v45, %v677_v52 }
 0x44c   :  { %v689_v53 = vmax.f32 %v687_v47, 0.0 }
 0x44e   :  { %691 = vst [vmem:[#allocation10 + $0x8] sm:$0xff] %v689_v53 }
 0x44f   :  { %v678_v54 = vpop.f32.mrf.mxu2  ;;  %702 = dma.vmem_to_hbm [thread:$0]  %s698_s21, 256, %s700_s23, [#allocation4]  }
 0x450   :  { %954 = dma.done.wait [#allocation4], 256  }
 0x451   :  { %955 = vsyncadd [#allocation4], 4294967040 }
 0x452   :  { %707 = vsyncpa [#allocation3], 1 }
 0x453   :  { %708 = vsyncpa [#allocation6], 1 }
 0x454   :  { %709 = vsyncpa [#allocation9], 1 }
 0x455   :  { %710 = vsyncpa [#allocation4], 1 }

</bundles_post_ra>
